<compile_context>
chip_gen: v7x
topology: tpu7x:2x2x1
jax: 0.10.0
libtpu: 0.0.40
codegen_flags: <defaults>
</compile_context>

<pallas_src>
import jax
import jax.numpy as jnp
import numpy as np
from jax import lax
from jax.experimental import pallas as pl
from jax.experimental.pallas import tpu as pltpu


def _round_up(x, m):
    return ((x + m - 1) // m) * m


def _surviving_taps(weights, rates, H, W):
    """Static tap analysis.

    Returns (taps, w_mat): `taps` is a sorted tuple of (dh, dw) shifts that touch
    the valid image (|dh| < H and |dw| < W); `w_mat` is the (O, K*C) weight matrix
    packed in the same tap order, with taps from different rates that share a
    shift merged by summing their (O, C) weight slices (exact, since the module
    sums per-rate conv outputs).
    """
    shift_w = {}
    for r, w in zip(rates, weights):                       # w: (O, C, 3, 3)
        for kh in range(3):
            dh = (kh - 1) * r
            if abs(dh) >= H:
                continue
            for kw in range(3):
                dw = (kw - 1) * r
                if abs(dw) >= W:
                    continue
                tap = w[:, :, kh, kw]                      # (O, C)
                key = (dh, dw)
                shift_w[key] = shift_w[key] + tap if key in shift_w else tap
    taps = tuple(sorted(shift_w.keys()))
    w_mat = jnp.concatenate([shift_w[t] for t in taps], axis=1)   # (O, K*C)
    return taps, w_mat


def _aspp_matmul_kernel(p_ref, w_ref, b_ref, o_ref):
    # p_ref: (1, KC_pad, HW_pad)  bf16 im2col patch (one batch element)
    # w_ref: (O_pad, KC_pad)      bf16 packed/merged weights
    # b_ref: (O_pad, 1)           f32 summed bias
    # o_ref: (1, O_pad, HW_pad)   output, pixel axis lane-dense (mult of 128)
    acc = jnp.dot(w_ref[...], p_ref[0],
                  preferred_element_type=jnp.float32)      # (O_pad, HW_pad) f32
    o_ref[0] = (acc + b_ref[...]).astype(o_ref.dtype)      # f32 epilogue, one cast


def aspp_forward(x_nchw, weights, biases, rates):
    """weights: list of (O, C, 3, 3) arrays (PyTorch OIHW); biases: list of (O,)."""
    B, C, H, W = x_nchw.shape
    O = weights[0].shape[0]
    HW = H * W

    # --- static tap analysis: skip zero taps, merge duplicate shifts. ---
    taps, w_mat = _surviving_taps(weights, rates, H, W)
    K = len(taps)
    P_h = max(abs(dh) for dh, _ in taps)
    P_w = max(abs(dw) for _, dw in taps)

    KC = K * C
    KC_pad = _round_up(KC, 128)          # unmasked MXU feed along the contraction
    HW_pad = _round_up(HW, 128)          # lane-dense output pixel axis
    O_pad = _round_up(O, 8)              # sublane-aligned output channels only

    # --- weight / bias packing (bf16 weights, f32 bias for the f32 epilogue). ---
    w_pack = jnp.pad(w_mat, ((0, O_pad - O), (0, KC_pad - KC))).astype(jnp.bfloat16)
    b_sum = jnp.sum(jnp.stack(list(biases)), axis=0).astype(jnp.float32)
    b_pack = jnp.pad(b_sum, (0, O_pad - O)).reshape(O_pad, 1)

    # --- im2col in the wrapper (NCHW-native: no transposes anywhere). ---
    # patch[b, k*C + c, h*W + w] = x_padded[b, c, P_h + dh_k + h, P_w + dw_k + w]
    x_pad = jnp.pad(x_nchw, ((0, 0), (0, 0), (P_h, P_h), (P_w, P_w)))
    slabs = [x_pad[:, :, P_h + dh:P_h + dh + H, P_w + dw:P_w + dw + W]
             for (dh, dw) in taps]                               # each (B, C, H, W)
    patch = jnp.stack(slabs, axis=1).reshape(B, KC, HW)
    patch = jnp.pad(patch, ((0, 0), (0, KC_pad - KC), (0, HW_pad - HW)))
    patch = patch.astype(jnp.bfloat16)

    cost = pl.CostEstimate(
        flops=2 * B * O_pad * KC_pad * HW_pad,
        transcendentals=0,
        bytes_accessed=(B * KC_pad * HW_pad * 2 + O_pad * KC_pad * 2
                        + O_pad * 4 + B * O_pad * HW_pad * 4),
    )

    out = pl.pallas_call(
        _aspp_matmul_kernel,
        out_shape=jax.ShapeDtypeStruct((B, O_pad, HW_pad), x_nchw.dtype),
        grid=(B,),                                   # batch-parallel (v7x megacore)
        in_specs=[
            pl.BlockSpec((1, KC_pad, HW_pad), lambda b: (b, 0, 0)),
            pl.BlockSpec((O_pad, KC_pad), lambda b: (0, 0)),
            pl.BlockSpec((O_pad, 1), lambda b: (0, 0)),
        ],
        out_specs=pl.BlockSpec((1, O_pad, HW_pad), lambda b: (b, 0, 0)),
        compiler_params=pltpu.CompilerParams(dimension_semantics=("parallel",)),
        cost_estimate=cost,
    )(patch, w_pack, b_pack)

    # Padded channels/pixels are sliced off; result is already NCHW.
    return out[:, :O, :HW].reshape(B, O, H, W)


def aspp_reference(x_nchw, weights, biases, rates):
    """Pure-XLA reference matching the PyTorch module (f32)."""
    out = None
    for w, b, r in zip(weights, biases, rates):
        y = lax.conv_general_dilated(
            x_nchw, w,
            window_strides=(1, 1),
            padding=[(r, r), (r, r)],
            rhs_dilation=(r, r),
            dimension_numbers=("NCHW", "OIHW", "NCHW"),
        ) + b.reshape(1, -1, 1, 1)
        out = y if out is None else out + y
    return out


if __name__ == "__main__":
    # Small shapes consistent with the module (DeepLab-v2 ASPP rates).
    B, C_in, C_out, H, W = 2, 4, 4, 16, 16
    rates = (6, 12, 18, 24)

    key = jax.random.PRNGKey(0)
    kx, *kws = jax.random.split(key, 1 + len(rates))

    x = jax.random.normal(kx, (B, C_in, H, W), dtype=jnp.float32)

    # Deterministic parameter init, matching nn.init.normal_(std=0.01) / zero bias.
    weights = [0.01 * jax.random.normal(k, (C_out, C_in, 3, 3), dtype=jnp.float32)
               for k in kws]
    biases = [jnp.zeros((C_out,), dtype=jnp.float32) for _ in rates]

    out = aspp_forward(x, weights, biases, rates)
    out = jax.block_until_ready(out)

    ref = jax.block_until_ready(aspp_reference(x, weights, biases, rates))
    # Tolerances loosened vs. the f32 version: inputs/weights are cast to bf16
    # (f32 accumulation), so per-element error is ~0.4% relative.
    np.testing.assert_allclose(np.asarray(out), np.asarray(ref),
                               rtol=2e-2, atol=3e-3)

    print("KERNEL_OK")
</pallas_src>

<mosaic_0001>
module attributes {stable_mosaic.version = 11 : i64} {
  func.func @_aspp_matmul_kernel(%arg0: i32, %arg1: memref<1x128x256xbf16, #tpu.memory_space<vmem>>, %arg2: memref<8x128xbf16, #tpu.memory_space<vmem>>, %arg3: memref<8x1xf32, #tpu.memory_space<vmem>>, %arg4: memref<1x8x256xf32, #tpu.memory_space<vmem>>) attributes {dimension_semantics = [#tpu.dimension_semantics<parallel>], iteration_bounds = array<i64: 2>, scalar_prefetch = 0 : i64, scratch_operands = 0 : i64, tpu.core_type = #tpu.core_type<tc>, window_params = [{transform_indices = @transform_0, window_bounds = array<i64: 1, 128, 256>}, {pipeline_mode = #tpu.pipeline_mode<synchronous>, transform_indices = @transform_1, window_bounds = array<i64: 8, 128>}, {pipeline_mode = #tpu.pipeline_mode<synchronous>, transform_indices = @transform_2, window_bounds = array<i64: 8, 1>}, {transform_indices = @transform_3, window_bounds = array<i64: 1, 8, 256>}]} {
    %c0 = arith.constant 0 : index
    %c0_0 = arith.constant 0 : index
    %0 = vector.load %arg2[%c0, %c0_0] : memref<8x128xbf16, #tpu.memory_space<vmem>>, vector<8x128xbf16>
    %c0_1 = arith.constant 0 : index
    %c0_2 = arith.constant 0 : index
    %c0_3 = arith.constant 0 : index
    %1 = vector.load %arg1[%c0_1, %c0_2, %c0_3] : memref<1x128x256xbf16, #tpu.memory_space<vmem>>, vector<1x128x256xbf16>
    %2 = vector.shape_cast %1 : vector<1x128x256xbf16> to vector<128x256xbf16>
    %cst = arith.constant dense<0.000000e+00> : vector<8x256xf32>
    %3 = tpu.matmul %0, %2, %cst {dimension_numbers = #tpu.dot_dimension_numbers<[1], [0], [0], [1], [0, 0, 1, 1], [], []>} : vector<8x128xbf16>, vector<128x256xbf16>, vector<8x256xf32> -> vector<8x256xf32>
    %c0_4 = arith.constant 0 : index
    %c0_5 = arith.constant 0 : index
    %4 = vector.load %arg3[%c0_4, %c0_5] : memref<8x1xf32, #tpu.memory_space<vmem>>, vector<8x1xf32>
    %5 = vector.broadcast %4 : vector<8x1xf32> to vector<8x256xf32>
    %6 = arith.addf %3, %5 : vector<8x256xf32>
    %c0_6 = arith.constant 0 : index
    %c0_7 = arith.constant 0 : index
    %c0_8 = arith.constant 0 : index
    %7 = vector.load %arg4[%c0_6, %c0_7, %c0_8] : memref<1x8x256xf32, #tpu.memory_space<vmem>>, vector<1x8x256xf32>
    %8 = vector.shape_cast %7 : vector<1x8x256xf32> to vector<8x256xf32>
    %9 = vector.shape_cast %6 : vector<8x256xf32> to vector<1x8x256xf32>
    tpu.vector_store %arg4[%c0_6, %c0_7, %c0_8], %9 {strides = array<i32>} : memref<1x8x256xf32, #tpu.memory_space<vmem>>, vector<1x8x256xf32>,
    return
  }
  func.func @transform_0(%arg0: i32) -> (i32, i32, i32) {
    %c0_i32 = arith.constant 0 : i32
    %c0_i32_0 = arith.constant 0 : i32
    %c0_i32_1 = arith.constant 0 : i32
    return %arg0, %c0_i32, %c0_i32_0 : i32, i32, i32
  }
  func.func @transform_1(%arg0: i32) -> (i32, i32) {
    %c0_i32 = arith.constant 0 : i32
    %c0_i32_0 = arith.constant 0 : i32
    %c0_i32_1 = arith.constant 0 : i32
    return %c0_i32, %c0_i32_0 : i32, i32
  }
  func.func @transform_2(%arg0: i32) -> (i32, i32) {
    %c0_i32 = arith.constant 0 : i32
    %c0_i32_0 = arith.constant 0 : i32
    %c0_i32_1 = arith.constant 0 : i32
    return %c0_i32, %c0_i32_0 : i32, i32
  }
  func.func @transform_3(%arg0: i32) -> (i32, i32, i32) {
    %c0_i32 = arith.constant 0 : i32
    %c0_i32_0 = arith.constant 0 : i32
    %c0_i32_1 = arith.constant 0 : i32
    return %arg0, %c0_i32, %c0_i32_0 : i32, i32, i32
  }
}

</mosaic_0001>

<bundles_post_ra>
// kernel: tpu_custom_call.1
= control target key start
LH: loop header
LB: loop body
LE: loop exit
PB: predicated region body
PF: predicated region fallthrough
CT: control target
= control target key end

     0   :  { %8 = vsyncpa [#allocation3], 0  ;;  %s835_s0 = inlined_call_operand.hbm [shape: bf16[2,128,256], index: 0, kind: input, shape index: {}]   ;;  %s836_s1 = inlined_call_operand.vmem [shape: bf16[8,128], index: 1, kind: input, shape index: {}]   ;;  %s837_s2 = inlined_call_operand.vmem [shape: f32[8,1], index: 2, kind: input, shape index: {}]   ;;  %s838_s3 = inlined_call_operand.hbm [shape: f32[2,8,256], index: 3, kind: output, shape index: {}]  }
   0x1   :  { %10 = vsyncpa [#allocation3 + $0x1], 0 }
   0x2   :  { %11 = vsyncpa [#allocation4], 0 }
   0x3   :  { %13 = vsyncpa [#allocation4 + $0x1], 0  ;;  %s650_s12 = smov 0   ;;  %s652_s13 = smov 0  }
   0x4   :  { %s654_s14 = smov 0   ;;  %s656_s15 = smov 0  }
   0x5 LB: > { %s671_s16 = sadd.s32 4294967295, %s623_s15   ;;  %s421_s17 = sadd.s32 4294967294, %s623_s15   ;;  %s623_s15 = sphi %s656_s15, %s851_s15   ;;  %s619_s14 = sphi %s654_s14, %s850_s14   ;;  %s615_s13 = sphi %s652_s13, %s849_s13   ;;  %s611_s12 = sphi %s650_s12, %s848_s12  }
   0x6   : > { %s675_s18 = sadd.s32 1, %s623_s15   ;;  %s26_s19 = sadd.s32 1, %s619_s14 }
   0x7   : > { %s23_s20 = ssub.s32 %s623_s15, %s675_s18  ;;  %p33_p0 = scmp.ne.s32.totalorder %s619_s14, %s615_s13 }
   0x8   : > { %p24_p1 = scmp.eq.s32.totalorder %s23_s20, 0  ;;  %p34_p2 = scmp.eq.s32.totalorder %s623_s15, 0 }
   0x9   : > { %p39_p3 = scmp.ne.s32.totalorder %s615_s13, %s611_s12  ;;  %p40_p4 = scmp.eq.s32.totalorder %s671_s16, 0 }
   0xa   : > { %s687_s21 = scalar_select %p24_p1, %s619_s14, %s26_s19  }
   0xb   : > { %p689_p5 = por %p34_p2, %p33_p0  ;;  %p693_p6 = por %p40_p4, %p39_p3 }
   0xc   : > { %p105_p7 = scmp.eq.s32.totalorder %s671_s16, 1  ;;  %p111_p8 = scmp.eq.s32.totalorder %s421_s17, 1 }
   0xd   : > { %p465_p10 = scmp.lt.s32.totalorder %s623_s15, 2  ;;  %s137_s26 = sand.u32 1, %s619_s14  }
   0xe   : > { %p700_p11 = por %p105_p7, %p33_p0  ;;  %p704_p12 = por %p111_p8, %p39_p3 }
   0xf   : > { %s451_s27 = sshll.u32 %s623_s15, 11  ;;  %s424_s28 = sshll.u32 %s137_s26, 7 }
  0x10   : > { %s842_s24 = scalar_select %p700_p11, 1, 0 }
  0x11   : > { %s843_s25 = scalar_select %p704_p12, 1, 0 }
  0x12   : > { %s713_s4 = scalar_lea.hbm %s835_s0, %s451_s27  ;;  %s141_s5 = scalar_lea.vmem [#allocation2], %s424_s28 }
  0x13   : > { %s148_s6 = sshll.u32 %s141_s5, 4  ;;  %p717_p13 = pnand %p465_p10, %p689_p5  ;;  %s721_s6 = int_to_ptr.vmem [resolvable:$true] %s148_s6 }
  0x14   : > { %s723_s8 = scalar_lea.sflag [#allocation3], %s137_s26  ;;  %s527_s9 = scalar_lea.hbm %s713_s4, 2048 }
  0x15   : > { %p528_p0 = scmp.ne.s32.totalorder %s713_s4, %s527_s9  ;;  %p529_p1 = pneg %p717_p13 }
  0x16   : > { %s532_s17 = scalar_lea.hbm %s835_s0, 4096  ;;  %p533_p4 = scmp.lt.u32.totalorder %s713_s4, %s835_s0 }
  0x17   : > { %p530_p2 = pnand %p529_p1, %p528_p0  ;;  %p534_p5 = scmp.lt.u32.totalorder %s532_s17, %s527_s9 }
  0x18   : > { %p536_p8 = scmp.lt.u32.totalorder %s527_s9, %s713_s4 }
  0x19   : > { %p531_p3 = pneg %p530_p2  ;;  %p535_p7 = por %p534_p5, %p533_p4 }
  0x1b   : > { %p537_p10 = por %p536_p8, %p535_p7 }
  0x1d   : > { %p538_p9 = pnand %p537_p10, %p531_p3 }
  0x1f   : > { %541 = shalt.err (!%p538_p9)
}
  0x20   : > { %s542_s22 = scalar_lea.vmem %s721_s6, 2048  ;;  %s625_s26 = smov [#allocation2]  }
  0x21   : > { %p543_p0 = scmp.ne.s32.totalorder %s721_s6, %s542_s22  ;;  %s547_s27 = sshll.u32 %s625_s26, 4  ;;  %s548_s27 = int_to_ptr.vmem [resolvable:$false] %s547_s27 }
  0x22   : > { %s549_s28 = scalar_lea.vmem %s548_s27, 4096  ;;  %p550_p11 = scmp.lt.s32.totalorder %s721_s6, %s548_s27 }
  0x23   : > { %p545_p2 = pnand %p543_p0, %p529_p1  ;;  %p551_p4 = scmp.lt.s32.totalorder %s549_s28, %s542_s22 }
  0x25   : > { %p546_p12 = pneg %p545_p2  ;;  %p552_p5 = por %p551_p4, %p550_p11 }
  0x27   : > { %p553_p7 = pnand %p552_p5, %p546_p12 }
  0x29   : > { %556 = shalt.err (!%p553_p7)
}
  0x2a   : > { %s626_s29 = smov 128   ;;  %s627_s30 = smov 8  }
  0x2b   : > { %460 = dma.hbm_to_vmem [thread:$0]  (!%p717_p13), %s713_s4, 2048, %s721_s6, %s723_s8, %s626_s29, %s626_s29, %s627_s30  }
  0x2c   : > { %p427_p9 = scmp.ge.s32.totalorder %s623_s15, 1  ;;  %p156_p1 = scmp.lt.s32.totalorder %s623_s15, 3 }
  0x2e   : > { %p157_p3 = pnand %p427_p9, %p156_p1 }
  0x2f   : > { %s754_s5 = sand.u32 (!%p157_p3), 1, %s615_s13  }
  0x30   : > { %160 = sbr.rel (%p157_p3) target bundleno = 319 (0x13f), region = 32  ;;  %s428_s9 = sshll.u32 (!%p157_p3), %s754_s5, 7 }
  0x31   : > { %s163_s10 = scalar_lea.sflag (!%p157_p3), [#allocation3], %s754_s5  ;;  %s758_s11 = scalar_lea.vmem (!%p157_p3), [#allocation2], %s428_s9 }
  0x37   : > { %602 = dma.done.wait (%p693_p6), %s163_s10, 2048  }
  0x38   : > { %604 = vsyncadd (%p693_p6), %s163_s10, 4294965248  ;;  %v628_v0 = vmov 0   ;;  %v503_v1 = vld [vmem:[%s758_s11 + $0x4] ss:$8 sps:$4 sm:$0xff]   ;;  %v505_v2 = vld [vmem:[%s758_s11] ss:$8 sps:$4 sm:$0xff]  }
  0x39   : > { %325 = vmatprep.mubr.bf16.mxu0 %v628_v0  ;;  %502 = vset.pattern.permute.xlu0 %v628_v0  ;;  %v506_v3 = vld [vmem:[%s758_s11 + $0x14] ss:$8 sps:$4 sm:$0xff]   ;;  %v508_v4 = vld [vmem:[%s758_s11 + $0x10] ss:$8 sps:$4 sm:$0xff]   ;;  %v509_v5 = vld [vmem:[%s758_s11 + $0x24] ss:$8 sps:$4 sm:$0xff]  }
  0x3a   : > { %293 = vmatprep.subr.bf16.mxu0 %v503_v1  ;;  %v511_v6 = vld [vmem:[%s758_s11 + $0x20] ss:$8 sps:$4 sm:$0xff]   ;;  %v512_v7 = vld [vmem:[%s758_s11 + $0x34] ss:$8 sps:$4 sm:$0xff]   ;;  %v514_v8 = vld [vmem:[%s758_s11 + $0x30] ss:$8 sps:$4 sm:$0xff]  }
  0x3b   : > { %294 = vmatpush1.bf16.msra.mxu0 %v505_v2  ;;  %v207_v9 = vld [vmem:[%s837_s2] sm:$0xff]  ;;  %v518_v12 = vld [vmem:[%s758_s11 + $0x54] ss:$8 sps:$4 sm:$0xff]   ;;  %v520_v13 = vld [vmem:[%s758_s11 + $0x50] ss:$8 sps:$4 sm:$0xff]   ;;  %s429_s8 = sshll.u32 %s754_s5, 4 }
  0x3c   : > { %295 = vmatprep.subr.bf16.mxu0 %v506_v3  ;;  %v515_v10 = vld [vmem:[%s758_s11 + $0x44] ss:$8 sps:$4 sm:$0xff]   ;;  %210 = vperm.xlu0 %502, %v207_v9   ;;  %v517_v11 = vld [vmem:[%s758_s11 + $0x40] ss:$8 sps:$4 sm:$0xff]   ;;  %v524_v16 = vld [vmem:[%s758_s11 + $0x74] ss:$8 sps:$4 sm:$0xff]  }
  0x3d   : > { %v521_v14 = vld [vmem:[%s758_s11 + $0x64] ss:$8 sps:$4 sm:$0xff]   ;;  %v523_v15 = vld [vmem:[%s758_s11 + $0x60] ss:$8 sps:$4 sm:$0xff]   ;;  %v526_v17 = vld [vmem:[%s758_s11 + $0x70] ss:$8 sps:$4 sm:$0xff]  }
  0x3e   : > { %v190_v18 = vld [vmem:[%s836_s1] sm:$0xf]  ;;  %s452_s17 = sshll.u32 %s671_s16, 8  ;;  %s188_s19 = scalar_lea.vmem [#allocation5], %s429_s8 }
  0x3f   : > { %296 = vmatpush1.bf16.msra.mxu0 %v508_v4  ;;  %s351_s20 = sshll.u32 %s188_s19, 4  ;;  %s791_s27 = scalar_lea.hbm %s838_s3, %s452_s17  ;;  %s793_s20 = int_to_ptr.vmem [resolvable:$true] %s351_s20 }
  0x40   : > { %297 = vmatprep.subr.bf16.mxu0 %v509_v5  ;;  %s337_s16 = scalar_lea.sflag [#allocation4], %s754_s5  ;;  %s557_s28 = scalar_lea.vmem %s793_s20, 256 }
  0x41   : > { %p558_p6 = scmp.ne.s32.totalorder %s793_s20, %s557_s28  ;;  %p845_p11 = scmp.ne.s32.totalorder %s842_s24, 0 }
  0x42   : > { %s629_s29 = smov [#allocation5]  }
  0x43   : > { %298 = vmatpush1.bf16.msra.mxu0 %v511_v6  ;;  %p559_p12 = pnand %p558_p6, %p845_p11  ;;  %s561_s30 = sshll.u32 %s629_s29, 4  ;;  %s562_s30 = int_to_ptr.vmem [resolvable:$false] %s561_s30 }
  0x44   : > { %299 = vmatprep.subr.bf16.mxu0 %v512_v7  ;;  %s563_s9 = scalar_lea.vmem %s562_s30, 512  ;;  %p564_p8 = scmp.lt.s32.totalorder %s793_s20, %s562_s30 }
  0x45   : > { %p560_p13 = pneg %p559_p12  ;;  %p565_p10 = scmp.lt.s32.totalorder %s563_s9, %s557_s28 }
  0x47   : > { %300 = vmatpush1.bf16.msra.mxu0 %v514_v8  ;;  %p566_p0 = por %p565_p10, %p564_p8 }
  0x48   : > { %301 = vmatprep.subr.bf16.mxu0 %v515_v10 }
  0x49   : > { %p567_p2 = pnand %p566_p0, %p560_p13 }
  0x4b   : > { %302 = vmatpush1.bf16.msra.mxu0 %v517_v11 }
  0x4c   : > { %303 = vmatprep.subr.bf16.mxu0 %v518_v12 }
  0x4f   : > { %304 = vmatpush1.bf16.msra.mxu0 %v520_v13 }
  0x50   : > { %305 = vmatprep.subr.bf16.mxu0 %v521_v14 }
  0x53   : > { %306 = vmatpush1.bf16.msra.mxu0 %v523_v15 }
  0x54   : > { %307 = vmatprep.subr.bf16.mxu0 %v524_v16 }
  0x57   : > { %308 = vmatpush1.bf16.msra.mxu0 %v526_v17 }
  0x5a   : > { %326 = vmatmul.mubr.bf16.vlgmr.msra.gmra.mrb[0].mxu0 %v190_v18 }
  0xbb   : > { %v211_v19 = vpop.permute.xlu0 %210 }
 0x12d   : > { %v327_v20 = vpop.f32.mrb[0].mxu0 }
 0x12e   : > { %v328_v21 = vadd.f32 %v327_v20, %v211_v19  ;;  %v329_v22 = vpop.f32.mrb[1].mxu0 }
 0x12f   : > { %v330_v23 = vadd.f32 %v329_v22, %v211_v19  ;;  %v331_v24 = vpop.f32.mrb[2].mxu0 }
 0x130   : > { %334 = vst [vmem:[%s188_s19] sm:$0xff] %v328_v21  ;;  %v332_v25 = vpop.f32.mrb[3].mxu0 }
 0x131   : > { %335 = vst [vmem:[%s188_s19 + $0x8] sm:$0xff] %v330_v23 }
 0x132   : > { %570 = shalt.err (!%p567_p2)
}
 0x133   : > { %s571_s5 = scalar_lea.hbm %s791_s27, 256  ;;  %s575_s23 = scalar_lea.hbm %s838_s3, 512 }
 0x134   : > { %p572_p4 = scmp.ne.s32.totalorder %s791_s27, %s571_s5  ;;  %p576_p9 = scmp.lt.u32.totalorder %s791_s27, %s838_s3 }
 0x135   : > { %p577_p1 = scmp.lt.u32.totalorder %s575_s23, %s571_s5  ;;  %p579_p6 = scmp.lt.u32.totalorder %s571_s5, %s791_s27 }
 0x136   : > { %p573_p5 = pnand %p572_p4, %p845_p11 }
 0x137   : > { %p578_p3 = por %p577_p1, %p576_p9 }
 0x138   : > { %p574_p7 = pneg %p573_p5 }
 0x139   : > { %p580_p12 = por %p579_p6, %p578_p3 }
 0x13b   : > { %p581_p13 = pnand %p580_p12, %p574_p7 }
 0x13d   : > { %584 = shalt.err (!%p581_p13)
}
 0x13e   : > { %455 = dma.vmem_to_hbm [thread:$0]  (%p845_p11), %s793_s20, 256, %s791_s27, %s337_s16  }
 0x13f PF: > { %s363_s7 = sand.u32 1, %s611_s12   ;;  %p846_p8 = scmp.ne.s32.totalorder %s843_s25, 0 }
 0x140   : > { %p847_p10 = scmp.ge.s32.totalorder %s623_s15, 2  ;;  %s364_s8 = scalar_lea.sflag [#allocation4], %s363_s7 }
 0x142   : > { %p462_p0 = pnand %p847_p10, %p846_p8 }
 0x144   : > { %606 = dma.done.wait (!%p462_p0), %s364_s8, 256  }
 0x145   : > { %608 = vsyncadd (!%p462_p0), %s364_s8, 4294967040  ;;  %p16_p2 = scmp.ge.s32.totalorder %s675_s18, 4   ;;  %s848_s12 = smov %s615_s13 }
 0x146   : > { %s849_s13 = smov %s619_s14  ;;  %s850_s14 = smov %s687_s21 }
 0x147   : > { %s851_s15 = smov %s675_s18  ;;  %18 = sbr.rel (!%p16_p2) target bundleno = 5 (0x5), region = 77 }
 0x14e   :  { %369 = vsyncpa [#allocation3], 1 }
 0x14f   :  { %371 = vsyncpa [#allocation3 + $0x1], 1 }
 0x150   :  { %372 = vsyncpa [#allocation4], 1 }
 0x151   :  { %374 = vsyncpa [#allocation4 + $0x1], 1 }

</bundles_post_ra>
